<compile_context>
chip_gen: v7x
topology: tpu7x:2x2x1
jax: 0.10.0
libtpu: 0.0.40
codegen_flags: <defaults>
</compile_context>

<pallas_src>
import jax
import jax.numpy as jnp
from jax.experimental import pallas as pl
from jax.experimental.pallas import tpu as pltpu


def _coord_att_kernel(x_ref, w1_ref, b1_ref, wh_ref, bh_ref, ww_ref, bw_ref,
                      ph_ref, pw_ref, eh_ref, ew_ref, o_ref):
    """One grid step: a (Bb, C, H*W) lane-dense block of the batch."""
    # Small parameters / constant matrices, loaded once per grid step.
    w1 = w1_ref[...]          # (mip, C)  conv1 weight, BN folded in
    b1 = b1_ref[...]          # (mip, 1)  conv1 bias,  BN folded in
    wh = wh_ref[...]          # (C, mip)
    bh = bh_ref[...]          # (C, 1)
    ww = ww_ref[...]          # (C, mip)
    bw = bw_ref[...]          # (C, 1)
    ph = ph_ref[...]          # (H*W, H)  avg-over-W matrix
    pw = pw_ref[...]          # (H*W, W)  avg-over-H matrix
    eh = eh_ref[...]          # (H, H*W)  0/1 expansion matrix (repeat over W)
    ew = ew_ref[...]          # (W, H*W)  0/1 expansion matrix (tile over H)

    bb = x_ref.shape[0]
    for b in range(bb):                               # small static unroll
        xb = x_ref[b].astype(jnp.float32)             # (C, H*W), lane-dense

        # Directional adaptive average pooling as lane-dense MXU matmuls.
        pool_h = jnp.dot(xb, ph, preferred_element_type=jnp.float32)  # (C, H)
        pool_w = jnp.dot(xb, pw, preferred_element_type=jnp.float32)  # (C, W)

        # conv1 (1x1, BN folded) + SiLU, applied per direction (positionwise,
        # so splitting == concat -> conv -> split, with no relayout copies).
        y_h = jnp.dot(w1, pool_h, preferred_element_type=jnp.float32) + b1
        y_h = y_h * jax.nn.sigmoid(y_h)                                # (mip, H)
        y_w = jnp.dot(w1, pool_w, preferred_element_type=jnp.float32) + b1
        y_w = y_w * jax.nn.sigmoid(y_w)                                # (mip, W)

        # Per-direction attention gates.
        a_h = jax.nn.sigmoid(
            jnp.dot(wh, y_h, preferred_element_type=jnp.float32) + bh)  # (C, H)
        a_w = jax.nn.sigmoid(
            jnp.dot(ww, y_w, preferred_element_type=jnp.float32) + bw)  # (C, W)

        # Expand the gates back to (C, H*W) with 0/1 matmuls (MXU) and apply.
        gate = (jnp.dot(a_h, eh, preferred_element_type=jnp.float32)
                * jnp.dot(a_w, ew, preferred_element_type=jnp.float32))
        o_ref[b] = (xb * gate).astype(o_ref.dtype)


def _pick_block_b(B, C, HW, itemsize, budget_bytes):
    """Largest batch block that fits the VMEM budget and divides B."""
    # Rough per-batch-element VMEM cost: double-buffered in + out blocks (4x)
    # plus a handful of f32 temporaries (x copy, gate, product) inside the body.
    per_elem = C * HW * max(itemsize, 4)
    cost_per_b = 8 * per_elem
    bb = max(1, min(B, budget_bytes // max(cost_per_b, 1)))
    if B >= 2:
        bb = min(bb, B // 2)   # keep >=2 parallel grid steps for 2-TC chips
    while B % bb:              # keep blocks exact divisors of B
        bb -= 1
    return bb


def coord_att_pallas(x, params, *, block_budget_bytes=24 << 20,
                     vmem_limit_bytes=48 << 20):
    """x: (B, C, H, W); params: tuple from init_params()."""
    B, C, H, W = x.shape
    HW = H * W
    w1, b1, bn_scale, bn_shift, wh, bh, ww, bw = params
    mip = w1.shape[0]

    # Fold BatchNorm (eval mode) and the conv1 bias together in the wrapper.
    w1f = (w1 * bn_scale).astype(jnp.float32)              # (mip, C)
    b1f = (b1 * bn_scale + bn_shift).astype(jnp.float32)   # (mip, 1)

    # Constant pooling / expansion matrices (tiny, built once outside kernel).
    eh = jnp.kron(jnp.eye(H, dtype=jnp.float32),
                  jnp.ones((1, W), jnp.float32))            # (H, H*W)
    ew = jnp.kron(jnp.ones((1, H), jnp.float32),
                  jnp.eye(W, dtype=jnp.float32))            # (W, H*W)
    ph = (eh / W).T                                         # (H*W, H)
    pw = (ew / H).T                                         # (H*W, W)

    bb = _pick_block_b(B, C, HW, x.dtype.itemsize, block_budget_bytes)
    x_flat = x.reshape(B, C, HW)   # free: NCHW is contiguous

    def const_spec(shape):
        return pl.BlockSpec(shape, lambda b: (0,) * len(shape))

    out_flat = pl.pallas_call(
        _coord_att_kernel,
        out_shape=jax.ShapeDtypeStruct((B, C, HW), x.dtype),
        grid_spec=pltpu.PrefetchScalarGridSpec(
            num_scalar_prefetch=0,
            grid=(B // bb,),
            in_specs=[
                pl.BlockSpec((bb, C, HW), lambda b: (b, 0, 0)),  # x (lane-dense)
                const_spec((mip, C)),   # conv1 weight (BN folded)
                const_spec((mip, 1)),   # conv1 bias   (BN folded)
                const_spec((C, mip)),   # conv_h weight
                const_spec((C, 1)),     # conv_h bias
                const_spec((C, mip)),   # conv_w weight
                const_spec((C, 1)),     # conv_w bias
                const_spec((HW, H)),    # avg-over-W matrix
                const_spec((HW, W)),    # avg-over-H matrix
                const_spec((H, HW)),    # h-expansion matrix
                const_spec((W, HW)),    # w-expansion matrix
            ],
            out_specs=pl.BlockSpec((bb, C, HW), lambda b: (b, 0, 0)),
        ),
        compiler_params=pltpu.CompilerParams(
            dimension_semantics=("parallel",),
            vmem_limit_bytes=vmem_limit_bytes),
    )(x_flat, w1f, b1f, wh, bh, ww, bw, ph, pw, eh, ew)

    return out_flat.reshape(B, C, H, W)


def coord_att_reference(x, params):
    """Pure-JAX reference matching the PyTorch forward (BN in eval mode)."""
    w1, b1, bn_scale, bn_shift, wh, bh, ww, bw = params
    H = x.shape[2]
    pool_h = jnp.mean(x, axis=3)                                   # (B, C, H)
    pool_w = jnp.mean(x, axis=2)                                   # (B, C, W)
    y_in = jnp.concatenate([pool_h, pool_w], axis=2)               # (B, C, H+W)
    y = jnp.einsum('mc,bcn->bmn', w1, y_in) + b1[None]
    y = y * bn_scale[None] + bn_shift[None]
    y = y * jax.nn.sigmoid(y)                                      # SiLU
    y_h, y_w = y[:, :, :H], y[:, :, H:]
    a_h = jax.nn.sigmoid(jnp.einsum('cm,bmh->bch', wh, y_h) + bh[None])
    a_w = jax.nn.sigmoid(jnp.einsum('cm,bmw->bcw', ww, y_w) + bw[None])
    return x * a_h[:, :, :, None] * a_w[:, :, None, :]


def init_params(key, channels, reduction=32):
    """Deterministic synthetic weights; shapes match CoordAtt.__init__."""
    mip = max(8, channels // reduction)
    k1, k2, k3, k4, k5, k6 = jax.random.split(key, 6)

    def conv_init(kw, kb, out_c, in_c):
        bound = 1.0 / jnp.sqrt(in_c)  # 1x1 conv fan_in = in_c
        w = jax.random.uniform(kw, (out_c, in_c), jnp.float32, -bound, bound)
        b = jax.random.uniform(kb, (out_c, 1), jnp.float32, -bound, bound)
        return w, b

    w1, b1 = conv_init(k1, k2, mip, channels)
    wh, bh = conv_init(k3, k4, channels, mip)
    ww, bw = conv_init(k5, k6, channels, mip)

    # BatchNorm2d(mip) freshly initialized, eval mode:
    # gamma=1, beta=0, running_mean=0, running_var=1, eps=1e-5
    eps = 1e-5
    gamma = jnp.ones((mip, 1), jnp.float32)
    beta = jnp.zeros((mip, 1), jnp.float32)
    r_mean = jnp.zeros((mip, 1), jnp.float32)
    r_var = jnp.ones((mip, 1), jnp.float32)
    bn_scale = gamma / jnp.sqrt(r_var + eps)
    bn_shift = beta - r_mean * bn_scale

    return (w1, b1, bn_scale, bn_shift, wh, bh, ww, bw)


if __name__ == "__main__":
    B, C, H, W = 2, 4, 16, 16
    key = jax.random.PRNGKey(0)
    kx, kp = jax.random.split(key)
    x = jax.random.normal(kx, (B, C, H, W), jnp.float32)
    params = init_params(kp, C, reduction=32)

    out = coord_att_pallas(x, params)
    out = jax.block_until_ready(out)

    ref = coord_att_reference(x, params)
    assert out.shape == (B, C, H, W)
    assert jnp.allclose(out, ref, rtol=1e-4, atol=1e-5), "mismatch vs reference"

    print("KERNEL_OK")
</pallas_src>

<mosaic_0001>
module attributes {stable_mosaic.version = 11 : i64} {
  func.func @_coord_att_kernel(%arg0: i32, %arg1: memref<1x4x256xf32, #tpu.memory_space<vmem>>, %arg2: memref<8x4xf32, #tpu.memory_space<vmem>>, %arg3: memref<8x1xf32, #tpu.memory_space<vmem>>, %arg4: memref<4x8xf32, #tpu.memory_space<vmem>>, %arg5: memref<4x1xf32, #tpu.memory_space<vmem>>, %arg6: memref<4x8xf32, #tpu.memory_space<vmem>>, %arg7: memref<4x1xf32, #tpu.memory_space<vmem>>, %arg8: memref<256x16xf32, #tpu.memory_space<vmem>>, %arg9: memref<256x16xf32, #tpu.memory_space<vmem>>, %arg10: memref<16x256xf32, #tpu.memory_space<vmem>>, %arg11: memref<16x256xf32, #tpu.memory_space<vmem>>, %arg12: memref<1x4x256xf32, #tpu.memory_space<vmem>>) attributes {dimension_semantics = [#tpu.dimension_semantics<parallel>], iteration_bounds = array<i64: 2>, scalar_prefetch = 0 : i64, scratch_operands = 0 : i64, tpu.core_type = #tpu.core_type<tc>, window_params = [{transform_indices = @transform_0, window_bounds = array<i64: 1, 4, 256>}, {pipeline_mode = #tpu.pipeline_mode<synchronous>, transform_indices = @transform_1, window_bounds = array<i64: 8, 4>}, {pipeline_mode = #tpu.pipeline_mode<synchronous>, transform_indices = @transform_2, window_bounds = array<i64: 8, 1>}, {pipeline_mode = #tpu.pipeline_mode<synchronous>, transform_indices = @transform_3, window_bounds = array<i64: 4, 8>}, {pipeline_mode = #tpu.pipeline_mode<synchronous>, transform_indices = @transform_4, window_bounds = array<i64: 4, 1>}, {pipeline_mode = #tpu.pipeline_mode<synchronous>, transform_indices = @transform_5, window_bounds = array<i64: 4, 8>}, {pipeline_mode = #tpu.pipeline_mode<synchronous>, transform_indices = @transform_6, window_bounds = array<i64: 4, 1>}, {pipeline_mode = #tpu.pipeline_mode<synchronous>, transform_indices = @transform_7, window_bounds = array<i64: 256, 16>}, {pipeline_mode = #tpu.pipeline_mode<synchronous>, transform_indices = @transform_8, window_bounds = array<i64: 256, 16>}, {pipeline_mode = #tpu.pipeline_mode<synchronous>, transform_indices = @transform_9, window_bounds = array<i64: 16, 256>}, {pipeline_mode = #tpu.pipeline_mode<synchronous>, transform_indices = @transform_10, window_bounds = array<i64: 16, 256>}, {transform_indices = @transform_11, window_bounds = array<i64: 1, 4, 256>}]} {
    %c0 = arith.constant 0 : index
    %c0_0 = arith.constant 0 : index
    %0 = vector.load %arg2[%c0, %c0_0] : memref<8x4xf32, #tpu.memory_space<vmem>>, vector<8x4xf32>
    %c0_1 = arith.constant 0 : index
    %c0_2 = arith.constant 0 : index
    %1 = vector.load %arg3[%c0_1, %c0_2] : memref<8x1xf32, #tpu.memory_space<vmem>>, vector<8x1xf32>
    %c0_3 = arith.constant 0 : index
    %c0_4 = arith.constant 0 : index
    %2 = vector.load %arg4[%c0_3, %c0_4] : memref<4x8xf32, #tpu.memory_space<vmem>>, vector<4x8xf32>
    %c0_5 = arith.constant 0 : index
    %c0_6 = arith.constant 0 : index
    %3 = vector.load %arg5[%c0_5, %c0_6] : memref<4x1xf32, #tpu.memory_space<vmem>>, vector<4x1xf32>
    %c0_7 = arith.constant 0 : index
    %c0_8 = arith.constant 0 : index
    %4 = vector.load %arg6[%c0_7, %c0_8] : memref<4x8xf32, #tpu.memory_space<vmem>>, vector<4x8xf32>
    %c0_9 = arith.constant 0 : index
    %c0_10 = arith.constant 0 : index
    %5 = vector.load %arg7[%c0_9, %c0_10] : memref<4x1xf32, #tpu.memory_space<vmem>>, vector<4x1xf32>
    %c0_11 = arith.constant 0 : index
    %c0_12 = arith.constant 0 : index
    %6 = vector.load %arg8[%c0_11, %c0_12] : memref<256x16xf32, #tpu.memory_space<vmem>>, vector<256x16xf32>
    %c0_13 = arith.constant 0 : index
    %c0_14 = arith.constant 0 : index
    %7 = vector.load %arg9[%c0_13, %c0_14] : memref<256x16xf32, #tpu.memory_space<vmem>>, vector<256x16xf32>
    %c0_15 = arith.constant 0 : index
    %c0_16 = arith.constant 0 : index
    %8 = vector.load %arg10[%c0_15, %c0_16] : memref<16x256xf32, #tpu.memory_space<vmem>>, vector<16x256xf32>
    %c0_17 = arith.constant 0 : index
    %c0_18 = arith.constant 0 : index
    %9 = vector.load %arg11[%c0_17, %c0_18] : memref<16x256xf32, #tpu.memory_space<vmem>>, vector<16x256xf32>
    %c0_19 = arith.constant 0 : index
    %c0_20 = arith.constant 0 : index
    %c0_21 = arith.constant 0 : index
    %10 = vector.load %arg1[%c0_19, %c0_20, %c0_21] : memref<1x4x256xf32, #tpu.memory_space<vmem>>, vector<1x4x256xf32>
    %11 = vector.shape_cast %10 : vector<1x4x256xf32> to vector<4x256xf32>
    %cst = arith.constant dense<0.000000e+00> : vector<4x16xf32>
    %12 = tpu.matmul %11, %6, %cst {dimension_numbers = #tpu.dot_dimension_numbers<[1], [0], [0], [1], [0, 0, 1, 1], [], []>} : vector<4x256xf32>, vector<256x16xf32>, vector<4x16xf32> -> vector<4x16xf32>
    %cst_22 = arith.constant dense<0.000000e+00> : vector<4x16xf32>
    %13 = tpu.matmul %11, %7, %cst_22 {dimension_numbers = #tpu.dot_dimension_numbers<[1], [0], [0], [1], [0, 0, 1, 1], [], []>} : vector<4x256xf32>, vector<256x16xf32>, vector<4x16xf32> -> vector<4x16xf32>
    %cst_23 = arith.constant dense<0.000000e+00> : vector<8x16xf32>
    %14 = tpu.matmul %0, %12, %cst_23 {dimension_numbers = #tpu.dot_dimension_numbers<[1], [0], [0], [1], [0, 0, 1, 1], [], []>} : vector<8x4xf32>, vector<4x16xf32>, vector<8x16xf32> -> vector<8x16xf32>
    %15 = vector.broadcast %1 : vector<8x1xf32> to vector<8x16xf32>
    %16 = arith.addf %14, %15 : vector<8x16xf32>
    %17 = arith.negf %16 : vector<8x16xf32>
    %18 = math.exp %17 : vector<8x16xf32>
    %cst_24 = arith.constant 1.000000e+00 : f32
    %19 = vector.broadcast %cst_24 : f32 to vector<8x16xf32>
    %20 = arith.addf %19, %18 : vector<8x16xf32>
    %21 = arith.divf %19, %20 : vector<8x16xf32>
    %22 = arith.mulf %16, %21 : vector<8x16xf32>
    %cst_25 = arith.constant dense<0.000000e+00> : vector<8x16xf32>
    %23 = tpu.matmul %0, %13, %cst_25 {dimension_numbers = #tpu.dot_dimension_numbers<[1], [0], [0], [1], [0, 0, 1, 1], [], []>} : vector<8x4xf32>, vector<4x16xf32>, vector<8x16xf32> -> vector<8x16xf32>
    %24 = vector.broadcast %1 : vector<8x1xf32> to vector<8x16xf32>
    %25 = arith.addf %23, %24 : vector<8x16xf32>
    %26 = arith.negf %25 : vector<8x16xf32>
    %27 = math.exp %26 : vector<8x16xf32>
    %cst_26 = arith.constant 1.000000e+00 : f32
    %28 = vector.broadcast %cst_26 : f32 to vector<8x16xf32>
    %29 = arith.addf %28, %27 : vector<8x16xf32>
    %30 = arith.divf %28, %29 : vector<8x16xf32>
    %31 = arith.mulf %25, %30 : vector<8x16xf32>
    %cst_27 = arith.constant dense<0.000000e+00> : vector<4x16xf32>
    %32 = tpu.matmul %2, %22, %cst_27 {dimension_numbers = #tpu.dot_dimension_numbers<[1], [0], [0], [1], [0, 0, 1, 1], [], []>} : vector<4x8xf32>, vector<8x16xf32>, vector<4x16xf32> -> vector<4x16xf32>
    %33 = vector.broadcast %3 : vector<4x1xf32> to vector<4x16xf32>
    %34 = arith.addf %32, %33 : vector<4x16xf32>
    %35 = arith.negf %34 : vector<4x16xf32>
    %36 = math.exp %35 : vector<4x16xf32>
    %cst_28 = arith.constant 1.000000e+00 : f32
    %37 = vector.broadcast %cst_28 : f32 to vector<4x16xf32>
    %38 = arith.addf %37, %36 : vector<4x16xf32>
    %39 = arith.divf %37, %38 : vector<4x16xf32>
    %cst_29 = arith.constant dense<0.000000e+00> : vector<4x16xf32>
    %40 = tpu.matmul %4, %31, %cst_29 {dimension_numbers = #tpu.dot_dimension_numbers<[1], [0], [0], [1], [0, 0, 1, 1], [], []>} : vector<4x8xf32>, vector<8x16xf32>, vector<4x16xf32> -> vector<4x16xf32>
    %41 = vector.broadcast %5 : vector<4x1xf32> to vector<4x16xf32>
    %42 = arith.addf %40, %41 : vector<4x16xf32>
    %43 = arith.negf %42 : vector<4x16xf32>
    %44 = math.exp %43 : vector<4x16xf32>
    %cst_30 = arith.constant 1.000000e+00 : f32
    %45 = vector.broadcast %cst_30 : f32 to vector<4x16xf32>
    %46 = arith.addf %45, %44 : vector<4x16xf32>
    %47 = arith.divf %45, %46 : vector<4x16xf32>
    %cst_31 = arith.constant dense<0.000000e+00> : vector<4x256xf32>
    %48 = tpu.matmul %39, %8, %cst_31 {dimension_numbers = #tpu.dot_dimension_numbers<[1], [0], [0], [1], [0, 0, 1, 1], [], []>} : vector<4x16xf32>, vector<16x256xf32>, vector<4x256xf32> -> vector<4x256xf32>
    %cst_32 = arith.constant dense<0.000000e+00> : vector<4x256xf32>
    %49 = tpu.matmul %47, %9, %cst_32 {dimension_numbers = #tpu.dot_dimension_numbers<[1], [0], [0], [1], [0, 0, 1, 1], [], []>} : vector<4x16xf32>, vector<16x256xf32>, vector<4x256xf32> -> vector<4x256xf32>
    %50 = arith.mulf %48, %49 : vector<4x256xf32>
    %51 = arith.mulf %11, %50 : vector<4x256xf32>
    %c0_33 = arith.constant 0 : index
    %c0_34 = arith.constant 0 : index
    %c0_35 = arith.constant 0 : index
    %52 = vector.load %arg12[%c0_33, %c0_34, %c0_35] : memref<1x4x256xf32, #tpu.memory_space<vmem>>, vector<1x4x256xf32>
    %53 = vector.shape_cast %52 : vector<1x4x256xf32> to vector<4x256xf32>
    %54 = vector.shape_cast %51 : vector<4x256xf32> to vector<1x4x256xf32>
    tpu.vector_store %arg12[%c0_33, %c0_34, %c0_35], %54 {strides = array<i32>} : memref<1x4x256xf32, #tpu.memory_space<vmem>>, vector<1x4x256xf32>,
    return
  }
  func.func @transform_0(%arg0: i32) -> (i32, i32, i32) {
    %c0_i32 = arith.constant 0 : i32
    %c0_i32_0 = arith.constant 0 : i32
    %c0_i32_1 = arith.constant 0 : i32
    return %arg0, %c0_i32, %c0_i32_0 : i32, i32, i32
  }
  func.func @transform_1(%arg0: i32) -> (i32, i32) {
    %c0_i32 = arith.constant 0 : i32
    %c0_i32_0 = arith.constant 0 : i32
    %c0_i32_1 = arith.constant 0 : i32
    return %c0_i32, %c0_i32_0 : i32, i32
  }
  func.func @transform_2(%arg0: i32) -> (i32, i32) {
    %c0_i32 = arith.constant 0 : i32
    %c0_i32_0 = arith.constant 0 : i32
    %c0_i32_1 = arith.constant 0 : i32
    return %c0_i32, %c0_i32_0 : i32, i32
  }
  func.func @transform_3(%arg0: i32) -> (i32, i32) {
    %c0_i32 = arith.constant 0 : i32
    %c0_i32_0 = arith.constant 0 : i32
    %c0_i32_1 = arith.constant 0 : i32
    return %c0_i32, %c0_i32_0 : i32, i32
  }
  func.func @transform_4(%arg0: i32) -> (i32, i32) {
    %c0_i32 = arith.constant 0 : i32
    %c0_i32_0 = arith.constant 0 : i32
    %c0_i32_1 = arith.constant 0 : i32
    return %c0_i32, %c0_i32_0 : i32, i32
  }
  func.func @transform_5(%arg0: i32) -> (i32, i32) {
    %c0_i32 = arith.constant 0 : i32
    %c0_i32_0 = arith.constant 0 : i32
    %c0_i32_1 = arith.constant 0 : i32
    return %c0_i32, %c0_i32_0 : i32, i32
  }
  func.func @transform_6(%arg0: i32) -> (i32, i32) {
    %c0_i32 = arith.constant 0 : i32
    %c0_i32_0 = arith.constant 0 : i32
    %c0_i32_1 = arith.constant 0 : i32
    return %c0_i32, %c0_i32_0 : i32, i32
  }
  func.func @transform_7(%arg0: i32) -> (i32, i32) {
    %c0_i32 = arith.constant 0 : i32
    %c0_i32_0 = arith.constant 0 : i32
    %c0_i32_1 = arith.constant 0 : i32
    return %c0_i32, %c0_i32_0 : i32, i32
  }
  func.func @transform_8(%arg0: i32) -> (i32, i32) {
    %c0_i32 = arith.constant 0 : i32
    %c0_i32_0 = arith.constant 0 : i32
    %c0_i32_1 = arith.constant 0 : i32
    return %c0_i32, %c0_i32_0 : i32, i32
  }
  func.func @transform_9(%arg0: i32) -> (i32, i32) {
    %c0_i32 = arith.constant 0 : i32
    %c0_i32_0 = arith.constant 0 : i32
    %c0_i32_1 = arith.constant 0 : i32
    return %c0_i32, %c0_i32_0 : i32, i32
  }
  func.func @transform_10(%arg0: i32) -> (i32, i32) {
    %c0_i32 = arith.constant 0 : i32
    %c0_i32_0 = arith.constant 0 : i32
    %c0_i32_1 = arith.constant 0 : i32
    return %c0_i32, %c0_i32_0 : i32, i32
  }
  func.func @transform_11(%arg0: i32) -> (i32, i32, i32) {
    %c0_i32 = arith.constant 0 : i32
    %c0_i32_0 = arith.constant 0 : i32
    %c0_i32_1 = arith.constant 0 : i32
    return %arg0, %c0_i32, %c0_i32_0 : i32, i32, i32
  }
}

</mosaic_0001>

<bundles_post_ra>
// kernel: tpu_custom_call.1
= control target key start
LH: loop header
LB: loop body
LE: loop exit
PB: predicated region body
PF: predicated region fallthrough
CT: control target
= control target key end

     0   :  { %16 = vsyncpa [#allocation3], 0  ;;  %s1912_s0 = inlined_call_operand.vmem [shape: f32[2,4,256], index: 0, kind: input, shape index: {}]   ;;  %s1913_s1 = inlined_call_operand.vmem [shape: f32[8,4], index: 1, kind: input, shape index: {}]   ;;  %s1914_s2 = inlined_call_operand.vmem [shape: f32[8,1], index: 2, kind: input, shape index: {}]   ;;  %s1915_s3 = inlined_call_operand.vmem [shape: f32[4,8], index: 3, kind: input, shape index: {}]   ;;  %s1916_s4 = inlined_call_operand.vmem [shape: f32[4,1], index: 4, kind: input, shape index: {}]   ;;  %s1917_s5 = inlined_call_operand.vmem [shape: f32[4,8], index: 5, kind: input, shape index: {}]   ;;  %s1918_s6 = inlined_call_operand.vmem [shape: f32[4,1], index: 6, kind: input, shape index: {}]   ;;  %s1919_s7 = inlined_call_operand.vmem [shape: f32[256,16], index: 7, kind: input, shape index: {}]   ;;  %s1920_s8 = inlined_call_operand.vmem [shape: f32[256,16], index: 8, kind: input, shape index: {}]   ;;  %s1921_s9 = inlined_call_operand.vmem [shape: f32[16,256], index: 9, kind: input, shape index: {}]   ;;  %s1922_s10 = inlined_call_operand.vmem [shape: f32[16,256], index: 10, kind: input, shape index: {}]   ;;  %s1923_s11 = inlined_call_operand.hbm [shape: f32[2,4,256], index: 11, kind: output, shape index: {}]  }
   0x1   :  { %18 = vsyncpa [#allocation3 + $0x1], 0  ;;  %s1562_s17 = smov 0   ;;  %s1564_s18 = smov 0  }
   0x2   :  { %s1566_s19 = smov 0   ;;  %s1568_s20 = smov 0  }
   0x3 LB: > { %1928 = sst [smem:[#allocation5_spill]] %s1492_s19  ;;  %s1583_s21 = sadd.s32 4294967295, %s1496_s20   ;;  %s1496_s20 = sphi %s1568_s20, %s1935_s20   ;;  %s1492_s19 = sphi %s1566_s19, %s1937_s19   ;;  %s1488_s18 = sphi %s1564_s18, %s1939_s18   ;;  %s1484_s17 = sphi %s1562_s17, %s1938_s17  }
   0x4   : > { %s1177_s22 = sadd.s32 4294967294, %s1496_s20   ;;  %s1587_s23 = sadd.s32 1, %s1496_s20  }
   0x5   : > { %1929 = sst [smem:[#allocation6_spill]] %s1587_s23  ;;  %s267_s24 = sadd.s32 1, %s1492_s19 }
   0x6   : > { %s264_s25 = ssub.s32 %s1496_s20, %s1587_s23  ;;  %p277_p0 = scmp.ne.s32.totalorder %s1492_s19, %s1488_s18 }
   0x7   : > { %p265_p1 = scmp.eq.s32.totalorder %s264_s25, 0  ;;  %p278_p2 = scmp.eq.s32.totalorder %s1583_s21, 1 }
   0x8   : > { %p283_p3 = scmp.ne.s32.totalorder %s1488_s18, %s1484_s17  ;;  %p284_p4 = scmp.eq.s32.totalorder %s1177_s22, 1 }
   0x9   : > { %s1598_s26 = scalar_select %p265_p1, %s1492_s19, %s267_s24  }
   0xa   : > { %p1600_p5 = por %p278_p2, %p277_p0  ;;  %p1604_p6 = por %p284_p4, %p283_p3 }
   0xb   : > { %1930 = sst [smem:[#allocation7_spill]] %s1598_s26  ;;  %p1180_p7 = scmp.ge.s32.totalorder %s1496_s20, 1 }
   0xc   : > { %s1932_s28 = scalar_select %p1604_p6, 1, 0 }
   0xd   : > { %p340_p8 = scmp.lt.s32.totalorder %s1496_s20, 3 }
   0xe   : > { %1933 = sst [smem:[#allocation8_spill]] %s1932_s28 }
   0xf   : > { %p341_p9 = pnand %p1180_p7, %p340_p8 }
  0x10   : > { %v407_v0 = vld [vmem:[%s1919_s7 + $0x80] sm:$0xff] (!%p341_p9)  ;;  %v408_v1 = vld [vmem:[%s1919_s7 + $0x88] sm:$0xff] (!%p341_p9)  ;;  %v409_v11 = vld [vmem:[%s1919_s7 + $0x90] sm:$0xff] (!%p341_p9)  ;;  %p380_p10 = scmp.lt.s32.totalorder (!%p341_p9), %s1583_s21, 1  ;;  %vm1499_vm0 = vmmov (!%p341_p9), 0   ;;  %vm616_vm1 = vcmask (!%p341_p9), 1043456  }
  0x11   : > { %344 = sbr.rel (%p341_p9) target bundleno = 985 (0x3d9), region = 64  ;;  %v439_v2 = vld [vmem:[%s1920_s8 + $0x80] sm:$0xff] (!%p341_p9)  ;;  %v1301_v3 = vpack.c.bf16 (!%p341_p9), %v408_v1, %v407_v0  ;;  %v440_v4 = vld [vmem:[%s1920_s8 + $0x88] sm:$0xff] (!%p341_p9)  ;;  %v410_v13 = vld [vmem:[%s1919_s7 + $0x98] sm:$0xff] (!%p341_p9)  ;;  %vm612_vm2 = vcmask (!%p341_p9), 31744   ;;  %vm782_vm3 = vcmask (!%p341_p9), 64512  }
  0x12   : > { %v391_v5 = vld [vmem:[%s1919_s7] sm:$0xff] (!%p341_p9)  ;;  %v392_v6 = vld [vmem:[%s1919_s7 + $0x8] sm:$0xff] (!%p341_p9)  ;;  %v1333_v7 = vpack.c.bf16 (!%p341_p9), %v440_v4, %v439_v2  ;;  %v441_v14 = vld [vmem:[%s1920_s8 + $0x90] sm:$0xff] (!%p341_p9)  ;;  %v1305_v16 = vpack.c.bf16 (!%p341_p9), %v410_v13, %v409_v11  ;;  %vm946_vm4 = vcmask (!%p341_p9), 130048   ;;  %s377_s12 = sand.u32 (!%p341_p9), 1, %s1488_s18   ;;  %s1202_s16 = sshll.u32 (!%p341_p9), %s1583_s21, 7 }
  0x13   : > { %v1303_v8 = vpack.c.bf16 (!%p341_p9), %v392_v6, %v391_v5  ;;  %v423_v9 = vld [vmem:[%s1920_s8] sm:$0xff] (!%p341_p9)  ;;  %v424_v10 = vld [vmem:[%s1920_s8 + $0x8] sm:$0xff] (!%p341_p9)  ;;  %1302 = vmatprep.subr.bf16.mxu0 (!%p341_p9), %v1301_v3  ;;  %v442_v15 = vld [vmem:[%s1920_s8 + $0x98] sm:$0xff] (!%p341_p9)  ;;  %s1181_s14 = sshll.u32 (!%p341_p9), %s377_s12, 3  ;;  %s1104_s26 = scalar_lea.sflag (!%p341_p9), [#allocation3], %s377_s12 }
  0x14   : > { %v1335_v12 = vpack.c.bf16 (!%p341_p9), %v424_v10, %v423_v9  ;;  %1334 = vmatprep.subr.bf16.mxu1 (!%p341_p9), %v1333_v7  ;;  %v1337_v17 = vpack.c.bf16 (!%p341_p9), %v442_v15, %v441_v14  ;;  %v393_v18 = vld [vmem:[%s1919_s7 + $0x10] sm:$0xff] (!%p341_p9)  ;;  %v394_v19 = vld [vmem:[%s1919_s7 + $0x18] sm:$0xff] (!%p341_p9)  ;;  %v411_v23 = vld [vmem:[%s1919_s7 + $0xa0] sm:$0xff] (!%p341_p9) }
  0x15   : > { %1304 = vmatpush3.bf16.msra.mxu0 (!%p341_p9), %v1303_v8  ;;  %v425_v20 = vld [vmem:[%s1920_s8 + $0x10] sm:$0xff] (!%p341_p9)  ;;  %v1307_v21 = vpack.c.bf16 (!%p341_p9), %v394_v19, %v393_v18  ;;  %v426_v22 = vld [vmem:[%s1920_s8 + $0x18] sm:$0xff] (!%p341_p9)  ;;  %v412_v24 = vld [vmem:[%s1919_s7 + $0xa8] sm:$0xff] (!%p341_p9) }
  0x16   : > { %1336 = vmatpush3.bf16.msra.mxu1 (!%p341_p9), %v1335_v12  ;;  %1306 = vmatprep.subr.bf16.mxu0 (!%p341_p9), %v1305_v16  ;;  %v1339_v25 = vpack.c.bf16 (!%p341_p9), %v426_v22, %v425_v20  ;;  %v1309_v26 = vpack.c.bf16 (!%p341_p9), %v412_v24, %v411_v23  ;;  %v443_v27 = vld [vmem:[%s1920_s8 + $0xa0] sm:$0xff] (!%p341_p9)  ;;  %v444_v28 = vld [vmem:[%s1920_s8 + $0xa8] sm:$0xff] (!%p341_p9)  ;;  %v413_v35 = vld [vmem:[%s1919_s7 + $0xb0] sm:$0xff] (!%p341_p9) }
  0x17   : > { %1338 = vmatprep.subr.bf16.mxu1 (!%p341_p9), %v1337_v17  ;;  %v395_v29 = vld [vmem:[%s1919_s7 + $0x20] sm:$0xff] (!%p341_p9)  ;;  %v1341_v30 = vpack.c.bf16 (!%p341_p9), %v444_v28, %v443_v27  ;;  %v396_v31 = vld [vmem:[%s1919_s7 + $0x28] sm:$0xff] (!%p341_p9)  ;;  %v414_v36 = vld [vmem:[%s1919_s7 + $0xb8] sm:$0xff] (!%p341_p9) }
  0x18   : > { %v427_v32 = vld [vmem:[%s1920_s8 + $0x20] sm:$0xff]  ;;  %v428_v33 = vld [vmem:[%s1920_s8 + $0x28] sm:$0xff]  ;;  %v1311_v34 = vpack.c.bf16 %v396_v31, %v395_v29  ;;  %v445_v37 = vld [vmem:[%s1920_s8 + $0xb0] sm:$0xff]  ;;  %v1313_v39 = vpack.c.bf16 %v414_v36, %v413_v35  ;;  %s1722_s15 = scalar_select %p380_p10, %s1583_s21, 1  ;;  %v1500_v36 = vmov 0  }
  0x19   : > { %1308 = vmatpush3.bf16.msra.mxu0 %v1307_v21  ;;  %v1343_v38 = vpack.c.bf16 %v428_v33, %v427_v32  ;;  %v446_v40 = vld [vmem:[%s1920_s8 + $0xb8] sm:$0xff]  ;;  %v397_v41 = vld [vmem:[%s1919_s7 + $0x30] sm:$0xff]  ;;  %v415_v46 = vld [vmem:[%s1919_s7 + $0xc0] sm:$0xff]  ;;  %1415 = vset.pattern.permute.xlu0 %v1500_v36  ;;  %s1501_s21 = smov [#allocation2]  }
  0x1a   : > { %1340 = vmatpush3.bf16.msra.mxu1 %v1339_v25  ;;  %1310 = vmatprep.subr.bf16.mxu0 %v1309_v26  ;;  %v398_v42 = vld [vmem:[%s1919_s7 + $0x38] sm:$0xff]  ;;  %v1345_v43 = vpack.c.bf16 %v446_v40, %v445_v37  ;;  %v429_v44 = vld [vmem:[%s1920_s8 + $0x30] sm:$0xff]  ;;  %v416_v47 = vld [vmem:[%s1919_s7 + $0xc8] sm:$0xff]  ;;  %s1201_s25 = sshll.u32 %s1722_s15, 3  ;;  %s1438_s23 = sshll.u32 %s1501_s21, 4  ;;  %s1439_s23 = int_to_ptr.vmem [resolvable:$false] %s1438_s23 }
  0x1b   : > { %1342 = vmatprep.subr.bf16.mxu1 %v1341_v30  ;;  %v430_v45 = vld [vmem:[%s1920_s8 + $0x38] sm:$0xff]  ;;  %v447_v48 = vld [vmem:[%s1920_s8 + $0xc0] sm:$0xff]  ;;  %v448_v49 = vld [vmem:[%s1920_s8 + $0xc8] sm:$0xff]  ;;  %v1315_v50 = vpack.c.bf16 %v398_v42, %v397_v41  ;;  %v1317_v52 = vpack.c.bf16 %v416_v47, %v415_v46  ;;  %s384_s13 = scalar_lea.vmem %s1912_s0, %s1201_s25  ;;  %1416 = vset.pattern.permute.xlu1 %v1500_v36  ;;  %s1870_s25 = scalar_lea.hbm %s1923_s11, %s1202_s16 }
  0x1c   : > { %v1347_v51 = vpack.c.bf16 %v430_v45, %v429_v44  ;;  %v399_v53 = vld [vmem:[%s1919_s7 + $0x40] sm:$0xff]  ;;  %v400_v54 = vld [vmem:[%s1919_s7 + $0x48] sm:$0xff]  ;;  %v1349_v56 = vpack.c.bf16 %v448_v49, %v447_v48  ;;  %v417_v58 = vld [vmem:[%s1919_s7 + $0xd0] sm:$0xff]  ;;  %s1440_s28 = scalar_lea.vmem %s1439_s23, 256 }
  0x1d   : > { %1312 = vmatpush3.bf16.msra.mxu0 %v1311_v34  ;;  %v431_v55 = vld [vmem:[%s1920_s8 + $0x40] sm:$0xff]  ;;  %v432_v57 = vld [vmem:[%s1920_s8 + $0x48] sm:$0xff]  ;;  %v418_v59 = vld [vmem:[%s1919_s7 + $0xd8] sm:$0xff]  ;;  %v1319_v62 = vpack.c.bf16 %v400_v54, %v399_v53  ;;  %v1498_v34 = vmov 0.0  }
  0x1e   : > { %1344 = vmatpush3.bf16.msra.mxu1 %v1343_v38  ;;  %1314 = vmatprep.subr.bf16.mxu0 %v1313_v39  ;;  %v449_v60 = vld [vmem:[%s1920_s8 + $0xd0] sm:$0xff]  ;;  %v450_v61 = vld [vmem:[%s1920_s8 + $0xd8] sm:$0xff]  ;;  %v1351_v63 = vpack.c.bf16 %v432_v57, %v431_v55  ;;  %v1321_v0 = vpack.c.bf16 %v418_v59, %v417_v58  ;;  %v419_v6 = vld [vmem:[%s1919_s7 + $0xe0] sm:$0xff] }
  0x1f   : > { %1346 = vmatprep.subr.bf16.mxu1 %v1345_v43  ;;  %v401_v1 = vld [vmem:[%s1919_s7 + $0x50] sm:$0xff]  ;;  %v402_v2 = vld [vmem:[%s1919_s7 + $0x58] sm:$0xff]  ;;  %v1353_v4 = vpack.c.bf16 %v450_v61, %v449_v60  ;;  %v420_v7 = vld [vmem:[%s1919_s7 + $0xe8] sm:$0xff] }
  0x20   : > { %v433_v3 = vld [vmem:[%s1920_s8 + $0x50] sm:$0xff]  ;;  %v434_v5 = vld [vmem:[%s1920_s8 + $0x58] sm:$0xff]  ;;  %v451_v8 = vld [vmem:[%s1920_s8 + $0xe0] sm:$0xff]  ;;  %v1323_v10 = vpack.c.bf16 %v402_v2, %v401_v1  ;;  %v1325_v13 = vpack.c.bf16 %v420_v7, %v419_v6 }
  0x21   : > { %1316 = vmatpush3.bf16.msra.mxu0 %v1315_v50  ;;  %v452_v9 = vld [vmem:[%s1920_s8 + $0xe8] sm:$0xff]  ;;  %v403_v11 = vld [vmem:[%s1919_s7 + $0x60] sm:$0xff]  ;;  %v1355_v12 = vpack.c.bf16 %v434_v5, %v433_v3  ;;  %v421_v19 = vld [vmem:[%s1919_s7 + $0xf0] sm:$0xff] }
  0x22   : > { %1348 = vmatpush3.bf16.msra.mxu1 %v1347_v51  ;;  %1318 = vmatprep.subr.bf16.mxu0 %v1317_v52  ;;  %v404_v14 = vld [vmem:[%s1919_s7 + $0x68] sm:$0xff]  ;;  %v435_v15 = vld [vmem:[%s1920_s8 + $0x60] sm:$0xff]  ;;  %v1357_v17 = vpack.c.bf16 %v452_v9, %v451_v8  ;;  %v422_v20 = vld [vmem:[%s1919_s7 + $0xf8] sm:$0xff] }
  0x23   : > { %1350 = vmatprep.subr.bf16.mxu1 %v1349_v56  ;;  %v1785_v16 = vld [vmem:[%s384_s13] sm:$0xff]  ;;  %v436_v18 = vld [vmem:[%s1920_s8 + $0x68] sm:$0xff]  ;;  %v453_v22 = vld [vmem:[%s1920_s8 + $0xf0] sm:$0xff]  ;;  %v1327_v24 = vpack.c.bf16 %v404_v14, %v403_v11  ;;  %v1329_v26 = vpack.c.bf16 %v422_v20, %v421_v19  ;;  %s379_s13 = scalar_lea.vmem [#allocation2], %s1181_s14 }
  0x24   : > { %v465_v21 = vcombine.high %v1785_v16, %v1785_v16  ;;  %v454_v23 = vld [vmem:[%s1920_s8 + $0xf8] sm:$0xff]  ;;  %v1359_v25 = vpack.c.bf16 %v436_v18, %v435_v15  ;;  %v405_v27 = vld [vmem:[%s1919_s7 + $0x70] sm:$0xff]  ;;  %v386_v35 = vld [vmem:[%s1914_s2] sm:$0xff]  ;;  %s1118_s15 = sshll.u32 %s379_s13, 4  ;;  %s1872_s15 = int_to_ptr.vmem [resolvable:$true] %s1118_s15 }
  0x25   : > { %1320 = vmatpush3.bf16.msra.mxu0 %v1319_v62  ;;  %v406_v28 = vld [vmem:[%s1919_s7 + $0x78] sm:$0xff]  ;;  %v1361_v29 = vpack.c.bf16 %v454_v23, %v453_v22  ;;  %v437_v30 = vld [vmem:[%s1920_s8 + $0x70] sm:$0xff]  ;;  %609 = vperm.xlu0 %1415, %v386_v35   ;;  %v388_v37 = vld [vmem:[%s1916_s4] sm:$0xf]  ;;  %s1434_s19 = scalar_lea.vmem %s1872_s15, 128  ;;  %p1441_p0 = scmp.lt.s32.totalorder %s1872_s15, %s1439_s23 }
  0x26   : > { %1352 = vmatpush3.bf16.msra.mxu1 %v1351_v63  ;;  %1322 = vmatprep.subr.bf16.mxu0 %v1321_v0  ;;  %v438_v31 = vld [vmem:[%s1920_s8 + $0x78] sm:$0xff]  ;;  %v1331_v32 = vpack.c.bf16 %v406_v28, %v405_v27  ;;  %v385_v43 = vld [vmem:[%s1913_s1] sm:$0xff]  ;;  %v456_v1 = vld [vmem:[%s1921_s9 + $0x8] sm:$0xff]  ;;  %p1435_p11 = scmp.ne.s32.totalorder %s1872_s15, %s1434_s19  ;;  %p1442_p1 = scmp.lt.s32.totalorder %s1440_s28, %s1434_s19 }
  0x27   : > { %1354 = vmatprep.subr.bf16.mxu1 %v1353_v4  ;;  %531 = vmatprep.mubr.f32.mxu0 %v465_v21  ;;  %v1363_v33 = vpack.c.bf16 %v438_v31, %v437_v30  ;;  %v390_v45 = vld [vmem:[%s1918_s6] sm:$0xf]  ;;  %v458_v2 = vld [vmem:[%s1921_s9 + $0x18] sm:$0xff]  ;;  %v460_v3 = vld [vmem:[%s1922_s10 + $0x8] sm:$0xff] }
  0x28   : > { %601 = vmatprep.mubr.f32.mxu1 %v465_v21  ;;  %864 = vperm.xlu1 %1416, %v390_v45   ;;  %v387_v62 = vld [vmem:[%s1915_s3] sm:$0xf]  ;;  %v1365_v4 = vpack.c.bf16 %v458_v2, %v456_v1  ;;  %v462_v5 = vld [vmem:[%s1922_s10 + $0x18] sm:$0xff]  ;;  %v457_v7 = vld [vmem:[%s1921_s9 + $0x10] sm:$0xff]  ;;  %p1436_p12 = pnand %p1435_p11, %p1600_p5  ;;  %p1443_p2 = por %p1442_p1, %p1441_p0 }
  0x29   : > { %1324 = vmatpush3.bf16.msra.mxu0 %v1323_v10  ;;  %779 = vperm.xlu0 %1415, %v388_v37   ;;  %v389_v0 = vld [vmem:[%s1917_s5] sm:$0xf]  ;;  %v1369_v8 = vpack.c.bf16 %v462_v5, %v460_v3  ;;  %v461_v11 = vld [vmem:[%s1922_s10 + $0x10] sm:$0xff] }
  0x2a   : > { %1356 = vmatpush3.bf16.msra.mxu1 %v1355_v12  ;;  %1326 = vmatprep.subr.bf16.mxu0 %v1325_v13  ;;  %v455_v6 = vld [vmem:[%s1921_s9] sm:$0xff]  ;;  %p1437_p13 = pneg %p1436_p12 }
  0x2b   : > { %1358 = vmatprep.subr.bf16.mxu1 %v1357_v17  ;;  %v1367_v9 = vpack.c.bf16 %v457_v7, %v455_v6  ;;  %v459_v10 = vld [vmem:[%s1922_s10] sm:$0xff] }
  0x2c   : > { %v1371_v12 = vpack.c.bf16 %v461_v11, %v459_v10  ;;  %p1444_p3 = pnand %p1443_p2, %p1437_p13 }
  0x2d   : > { %1328 = vmatpush3.bf16.msra.mxu0 %v1327_v24 }
  0x2e   : > { %1360 = vmatpush3.bf16.msra.mxu1 %v1359_v25  ;;  %1330 = vmatprep.subr.bf16.mxu0 %v1329_v26 }
  0x2f   : > { %1362 = vmatprep.subr.bf16.mxu1 %v1361_v29 }
  0x31   : > { %1332 = vmatpush3.bf16.msra.mxu0 %v1331_v32 }
  0x32   : > { %1364 = vmatpush3.bf16.msra.mxu1 %v1363_v33  ;;  %1281 = vmatprep.subr.mxu0 %v1498_v34 }
  0x33   : > { %1286 = vmatprep.subr.mxu1 %v1498_v34 }
  0x34   : > { %532 = vmatmul.mubr.f32.vlgmr.msra.gmra.mrb[0].mxu0 %v1785_v16 }
  0x35   : > { %602 = vmatmul.mubr.f32.vlgmr.msra.gmra.mrb[0].mxu1 %v1785_v16  ;;  %1283 = vmatprep.mubr.msk.f32.mxu0 %vm1499_vm0, %v1498_v34 }
  0x36   : > { %1288 = vmatprep.mubr.msk.f32.mxu1 %vm1499_vm0, %v1498_v34 }
  0xa4   : > { %v610_v46 = vpop.permute.xlu0 %609 }
  0xa7   : > { %v865_v13 = vpop.permute.xlu1 %864 }
  0xa8   : > { %v780_v14 = vpop.permute.xlu0 %779 }
 0x107   : > { %v1235_v38 = vpop.f32.mrb[0].mxu0 }
 0x108   : > { %v1270_v39 = vpop.f32.mrb[0].mxu1  ;;  %v1236_v40 = vpop.f32.mrb[1].mxu0 }
 0x109   : > { %v1237_v41 = vadd.f32 %v1236_v40, %v1235_v38  ;;  %v1271_v42 = vpop.f32.mrb[1].mxu1 }
 0x10a   : > { %v1272_v44 = vadd.f32 %v1271_v42, %v1270_v39 }
 0x10b   : > { %1282 = vmatpush3.msk.msra.mxu0 %vm616_vm1, %v1237_v41 }
 0x10c   : > { %1287 = vmatpush3.msk.msra.mxu1 %vm616_vm1, %v1272_v44  ;;  %1284 = vmatmul.mubr.msk.f32.vlgmr.msra.gmra.mrb[2].mxu0 %vm612_vm2, %v385_v43 }
 0x10d   : > { %1289 = vmatmul.mubr.msk.f32.vlgmr.msra.gmra.mrb[2].mxu1 %vm612_vm2, %v385_v43  ;;  %1291 = vmatprep.subr.mxu0 %v1498_v34 }
 0x10e   : > { %1296 = vmatprep.subr.mxu1 %v1498_v34  ;;  %1293 = vmatprep.mubr.msk.f32.mxu0 %vm1499_vm0, %v1498_v34 }
 0x10f   : > { %1298 = vmatprep.mubr.msk.f32.mxu1 %vm1499_vm0, %v1498_v34 }
 0x1df   : > { %v686_v47 = vpop.f32.mrb[2].mxu0 }
 0x1e0   : > { %v687_v48 = vadd.f32 %v686_v47, %v610_v46  ;;  %v766_v49 = vpop.f32.mrb[2].mxu1  ;;  %v1285_v50 = vpop.f32.mrb[3].mxu0 }
 0x1e1   : > { %v767_v51 = vadd.f32 %v766_v49, %v610_v46  ;;  %v1290_v52 = vpop.f32.mrb[3].mxu1 }
 0x1e2   : > { %v1186_v53 = vmul.f32 -1.442695, %v687_v48 }
 0x1e3   : > { %v1189_v54 = vmul.f32 -1.442695, %v767_v51 }
 0x1e4   : > { %1418 = vpow2.f32 %v1186_v53 }
 0x1e5   : > { %1420 = vpow2.f32 %v1189_v54 }
 0x1ee   : > { %v1419_v55 = vpop.eup %1418 }
 0x1ef   : > { %v1421_v56 = vpop.eup %1420  ;;  %v693_v57 = vadd.f32 1.0, %v1419_v55 }
 0x1f0   : > { %v773_v58 = vadd.f32 1.0, %v1421_v56 }
 0x1f1   : > { %1422 = vrcp.f32 %v693_v57 }
 0x1f2   : > { %1424 = vrcp.f32 %v773_v58 }
 0x1fb   : > { %v1423_v59 = vpop.eup %1422 }
 0x1fc   : > { %v1425_v60 = vpop.eup %1424  ;;  %v696_v61 = vmul.f32 %v1423_v59, %v687_v48 }
 0x1fd   : > { %v776_v63 = vmul.f32 %v1425_v60, %v767_v51 }
 0x1fe   : > { %1292 = vmatpush3.msra.mxu0 %v696_v61 }
 0x1ff   : > { %1297 = vmatpush3.msra.mxu1 %v776_v63  ;;  %1294 = vmatmul.mubr.msk.f32.vlgmr.msra.gmra.mrb[4].mxu0 %vm782_vm3, %v387_v62 }
 0x200   : > { %1299 = vmatmul.mubr.msk.f32.vlgmr.msra.gmra.mrb[4].mxu1 %vm782_vm3, %v389_v0  ;;  %1014 = vmatprep.mubr.f32.mxu0 %v1498_v34 }
 0x201   : > { %1088 = vmatprep.mubr.f32.mxu1 %v1498_v34  ;;  %1366 = vmatprep.subr.bf16.mxu0 %v1365_v4 }
 0x202   : > { %1370 = vmatprep.subr.bf16.mxu1 %v1369_v8  ;;  %1368 = vmatpush1.bf16.msra.mxu0 %v1367_v9 }
 0x203   : > { %1372 = vmatpush1.bf16.msra.mxu1 %v1371_v12 }
 0x2d2   : > { %v852_v15 = vpop.f32.mrb[4].mxu0 }
 0x2d3   : > { %v853_v17 = vadd.f32 %v852_v15, %v780_v14  ;;  %v936_v18 = vpop.f32.mrb[4].mxu1  ;;  %v1295_v19 = vpop.f32.mrb[5].mxu0 }
 0x2d4   : > { %v937_v20 = vadd.f32 %v936_v18, %v865_v13  ;;  %v1300_v21 = vpop.f32.mrb[5].mxu1 }
 0x2d5   : > { %v1191_v22 = vmul.f32 -1.442695, %v853_v17 }
 0x2d6   : > { %v1193_v23 = vmul.f32 -1.442695, %v937_v20 }
 0x2d7   : > { %1426 = vpow2.f32 %v1191_v22 }
 0x2d8   : > { %1428 = vpow2.f32 %v1193_v23 }
 0x2e1   : > { %v1427_v24 = vpop.eup %1426 }
 0x2e2   : > { %v1429_v25 = vpop.eup %1428  ;;  %v859_v26 = vadd.f32 1.0, %v1427_v24 }
 0x2e3   : > { %v943_v27 = vadd.f32 1.0, %v1429_v25 }
 0x2e4   : > { %1430 = vrcp.f32 %v859_v26 }
 0x2e5   : > { %1432 = vrcp.f32 %v943_v27 }
 0x2ee   : > { %v1431_v28 = vpop.eup %1430 }
 0x2ef   : > { %v1433_v29 = vpop.eup %1432  ;;  %1194 = vmatmul.mubr.msk.f32.vlgmr.msra.gmra.mrb[6].mxu0 %vm946_vm4, %v1431_v28 }
 0x2f0   : > { %1195 = vmatmul.mubr.msk.f32.vlgmr.msra.gmra.mrb[6].mxu1 %vm946_vm4, %v1433_v29 }
 0x3c2   : > { %v1016_v30 = vpop.f32.mrb[6].mxu0 }
 0x3c3   : > { %v1090_v31 = vpop.f32.mrb[6].mxu1  ;;  %v1018_v32 = vpop.f32.mrb[7].mxu0 }
 0x3c4   : > { %v1095_v33 = vmul.f32 %v1090_v31, %v1016_v30  ;;  %v1092_v34 = vpop.f32.mrb[7].mxu1 }
 0x3c5   : > { %v1096_v35 = vmul.f32 %v1092_v34, %v1018_v32 }
 0x3c7   : > { %v1099_v36 = vcombine.low %v1095_v33, %v1096_v35 }
 0x3c9   : > { %v1101_v37 = vmul.f32 %v1099_v36, %v1785_v16 }
 0x3cb   : > { %1102 = vst [vmem:[%s379_s13] sm:$0xff] %v1101_v37 }
 0x3cc   : > { %1447 = shalt.err (!%p1444_p3)
}
 0x3cd   : > { %s1448_s29 = scalar_lea.hbm %s1870_s25, 128  ;;  %s1452_s14 = scalar_lea.hbm %s1923_s11, 256 }
 0x3ce   : > { %p1449_p4 = scmp.ne.s32.totalorder %s1870_s25, %s1448_s29  ;;  %p1453_p9 = scmp.lt.u32.totalorder %s1870_s25, %s1923_s11 }
 0x3cf   : > { %p1454_p10 = scmp.lt.u32.totalorder %s1452_s14, %s1448_s29  ;;  %p1456_p12 = scmp.lt.u32.totalorder %s1448_s29, %s1870_s25 }
 0x3d0   : > { %p1450_p7 = pnand %p1449_p4, %p1600_p5 }
 0x3d1   : > { %p1455_p11 = por %p1454_p10, %p1453_p9 }
 0x3d2   : > { %p1451_p8 = pneg %p1450_p7 }
 0x3d3   : > { %p1457_p13 = por %p1456_p12, %p1455_p11 }
 0x3d5   : > { %p1458_p0 = pnand %p1457_p13, %p1451_p8 }
 0x3d7   : > { %1461 = shalt.err (!%p1458_p0)
}
 0x3d8   : > { %1373 = dma.vmem_to_hbm [thread:$0]  (%p1600_p5), %s1872_s15, 128, %s1870_s25, %s1104_s26  }
 0x3d9 PF: > { %p1379_p1 = scmp.ge.s32.totalorder %s1496_s20, 2  ;;  %s1130_s24 = sand.u32 1, %s1484_s17  }
 0x3da   : > { %s1131_s19 = scalar_lea.sflag [#allocation3], %s1130_s24 }
 0x3db   : > { %p1376_p2 = pnand %p1379_p1, %p1604_p6 }
 0x3dd   : > { %1479 = dma.done.wait (!%p1376_p2), %s1131_s19, 128  }
 0x3de   : > { %1481 = vsyncadd (!%p1376_p2), %s1131_s19, 4294967168  ;;  %s1935_s20 = sld [smem:[#allocation6_spill]]  ;;  %s1936_s21 = sld [smem:[#allocation5_spill]] }
 0x3df   : > { %s1937_s19 = sld [smem:[#allocation7_spill]]  ;;  %s1938_s17 = smov %s1488_s18 }
 0x3e4   : > { %p21_p3 = scmp.ge.s32.totalorder %s1935_s20, 4   ;;  %s1939_s18 = smov %s1936_s21 }
 0x3e6   :  { %23 = sbr.rel (!%p21_p3) target bundleno = 3 (0x3), region = 99 }
 0x3ed   :  { %1136 = vsyncpa [#allocation3], 1 }
 0x3ee   :  { %1138 = vsyncpa [#allocation3 + $0x1], 1 }

</bundles_post_ra>
